<compile_context>
chip_gen: v6e
topology: v6e:2x2x1
jax: 0.10.0
libtpu: 0.0.40
codegen_flags: <defaults>
</compile_context>

<pallas_src>
import math

import jax
import jax.numpy as jnp
from jax.experimental import pallas as pl
from jax.experimental.pallas import tpu as pltpu


def _gaussian_kernel(d_ref, p_ref, o_ref):
    """One grid step: rows [i*tm, (i+1)*tm) of the flattened output.

    d_ref: (tm, 1) f32  distances for this row tile (elements on sublanes)
    p_ref: (2, G)  f32  row 0 = centers, row 1 = -0.5 / widths**2 (resident)
    o_ref: (tm, G)      output tile (G on lanes)
    """
    d = d_ref[...]                  # (tm, 1)
    centers = p_ref[0:1, :]         # (1, G)
    coef = p_ref[1:2, :]            # (1, G)  == -0.5 / w**2
    diff = d - centers              # (tm, G) via sublane/lane broadcast
    o_ref[...] = jnp.exp(diff * diff * coef).astype(o_ref.dtype)


def _pick_tile_and_vmem():
    """Per-TPU-generation row tile and scoped-VMEM limit.

    Footprint ~= 2 * (2 * tm * 128 lanes * 4 B): double-buffered input column
    (lane-padded to 128) + double-buffered output tile (G=50 padded to 128).
    """
    try:
        kind = jax.devices()[0].device_kind.lower()
    except Exception:
        kind = ""
    if ("v6" in kind) or ("v5p" in kind) or ("v4" in kind):
        # 128 MiB physical VMEM; HBM-write bound -> big tile to amortize the
        # ~0.35 us/grid-step overhead.  ~32 MiB of buffers.
        return 16384, 56 << 20
    if ("v5e" in kind) or ("v5 lite" in kind) or ("v7" in kind) or ("7x" in kind):
        # v5e: tm=8192 needs ~17 MiB -> must raise the 16 MiB default scoped
        # limit.  v7x: only 64 MiB physical VMEM, keep the footprint modest.
        return 8192, 40 << 20
    # Unknown part: stay safely under the default scoped-VMEM limit.
    return 4096, None


def gaussian_distance_encoding(distances, widths, centers, *, tm=None,
                               out_dtype=jnp.float32, vmem_limit_bytes=None):
    """distances: (...,) f32; centers/widths: (G,) f32 -> (..., G) in out_dtype.

    out[..., g] = exp(-(d[...] - centers[g])**2 / (2 * widths[g]**2))
    widths == 0 yields inf/NaN coefficients, matching the PyTorch reference.
    """
    orig_shape = distances.shape
    G = centers.shape[0]
    M = math.prod(orig_shape)

    if tm is None:
        tm, auto_vmem = _pick_tile_and_vmem()
        if vmem_limit_bytes is None:
            vmem_limit_bytes = auto_vmem

    # Flattened row view: free reshape, no padding, no copy.
    d2 = distances.reshape(M, 1).astype(jnp.float32)

    # Precompute -0.5 / w**2 once; pack with centers into one resident block.
    coef = (-0.5) / (widths.astype(jnp.float32) ** 2)
    params = jnp.stack([centers.astype(jnp.float32), coef], axis=0)   # (2, G)

    # Ragged grid: last block's OOB reads are padded and OOB writes masked, so
    # no wrapper pad of the input and no out[:M] slice of the big output.
    tm_eff = M if M < tm else tm          # full-array block for tiny inputs
    grid = (pl.cdiv(M, tm_eff),)

    cp_kwargs = dict(dimension_semantics=("parallel",))
    if vmem_limit_bytes is not None:
        cp_kwargs["vmem_limit_bytes"] = int(vmem_limit_bytes)

    out = pl.pallas_call(
        _gaussian_kernel,
        out_shape=jax.ShapeDtypeStruct((M, G), out_dtype),
        grid_spec=pltpu.PrefetchScalarGridSpec(
            num_scalar_prefetch=0,
            grid=grid,
            in_specs=[
                pl.BlockSpec((tm_eff, 1), lambda i: (i, 0)),
                pl.BlockSpec((2, G), lambda i: (0, 0)),    # resident params
            ],
            out_specs=pl.BlockSpec((tm_eff, G), lambda i: (i, 0)),
        ),
        compiler_params=pltpu.CompilerParams(**cp_kwargs),
    )(d2, params)

    return out.reshape(orig_shape + (G,))


if __name__ == "__main__":
    # Deterministic parameter init (matches nn.Module __init__).
    num_gaussians = 50
    max_distance = 10.0
    centers = jnp.linspace(0.0, max_distance, num_gaussians, dtype=jnp.float32)
    widths = jnp.ones((num_gaussians,), dtype=jnp.float32) * 0.5

    def reference(d):
        return jnp.exp(
            -(d[..., None] - centers.reshape(1, 1, 1, -1)) ** 2
            / (2.0 * widths.reshape(1, 1, 1, -1) ** 2)
        )

    k1, k2 = jax.random.split(jax.random.PRNGKey(0))

    # Case 1: batch=2, 8 atoms -> pairwise distance matrix (2, 8, 8).
    d1 = jax.random.uniform(k1, (2, 8, 8), dtype=jnp.float32,
                            minval=0.0, maxval=max_distance)
    out1 = jax.block_until_ready(gaussian_distance_encoding(d1, widths, centers))
    assert out1.shape == (2, 8, 8, num_gaussians)
    assert jnp.allclose(out1, reference(d1), atol=1e-5, rtol=1e-5)

    # Case 2: exercises the ragged last grid block (M = 162, tm = 64 -> 3
    # blocks, last block only 34/64 rows valid) — validates the masked
    # writeback path that replaced the wrapper pad/slice.
    d2 = jax.random.uniform(k2, (2, 9, 9), dtype=jnp.float32,
                            minval=0.0, maxval=max_distance)
    out2 = jax.block_until_ready(
        gaussian_distance_encoding(d2, widths, centers, tm=64))
    assert out2.shape == (2, 9, 9, num_gaussians)
    assert jnp.allclose(out2, reference(d2), atol=1e-5, rtol=1e-5)

    print("KERNEL_OK")
</pallas_src>

<mosaic_0001>
module attributes {stable_mosaic.version = 11 : i64} {
  func.func @_gaussian_kernel(%arg0: i32, %arg1: memref<128x1xf32, #tpu.memory_space<vmem>>, %arg2: memref<2x50xf32, #tpu.memory_space<vmem>>, %arg3: memref<128x50xf32, #tpu.memory_space<vmem>>) attributes {dimension_semantics = [#tpu.dimension_semantics<parallel>], iteration_bounds = array<i64: 1>, scalar_prefetch = 0 : i64, scratch_operands = 0 : i64, tpu.core_type = #tpu.core_type<tc>, window_params = [{transform_indices = @transform_0, window_bounds = array<i64: 128, 1>}, {pipeline_mode = #tpu.pipeline_mode<synchronous>, transform_indices = @transform_1, window_bounds = array<i64: 2, 50>}, {transform_indices = @transform_2, window_bounds = array<i64: 128, 50>}]} {
    %c0 = arith.constant 0 : index
    %c0_0 = arith.constant 0 : index
    %0 = vector.load %arg1[%c0, %c0_0] : memref<128x1xf32, #tpu.memory_space<vmem>>, vector<128x1xf32>
    %c0_1 = arith.constant 0 : index
    %c0_2 = arith.constant 0 : index
    %1 = vector.load %arg2[%c0_1, %c0_2] : memref<2x50xf32, #tpu.memory_space<vmem>>, vector<1x50xf32>
    %c1 = arith.constant 1 : index
    %c0_3 = arith.constant 0 : index
    %2 = vector.load %arg2[%c1, %c0_3] : memref<2x50xf32, #tpu.memory_space<vmem>>, vector<1x50xf32>
    %3 = vector.broadcast %0 : vector<128x1xf32> to vector<128x50xf32>
    %4 = vector.broadcast %1 : vector<1x50xf32> to vector<128x50xf32>
    %5 = arith.subf %3, %4 : vector<128x50xf32>
    %6 = arith.mulf %5, %5 : vector<128x50xf32>
    %7 = vector.broadcast %2 : vector<1x50xf32> to vector<128x50xf32>
    %8 = arith.mulf %6, %7 : vector<128x50xf32>
    %9 = math.exp %8 : vector<128x50xf32>
    %c0_4 = arith.constant 0 : index
    %c0_5 = arith.constant 0 : index
    %10 = vector.load %arg3[%c0_4, %c0_5] : memref<128x50xf32, #tpu.memory_space<vmem>>, vector<128x50xf32>
    tpu.vector_store %arg3[%c0_4, %c0_5], %9 {strides = array<i32>} : memref<128x50xf32, #tpu.memory_space<vmem>>, vector<128x50xf32>,
    return
  }
  func.func @transform_0(%arg0: i32) -> (i32, i32) {
    %c0_i32 = arith.constant 0 : i32
    %c0_i32_0 = arith.constant 0 : i32
    return %arg0, %c0_i32 : i32, i32
  }
  func.func @transform_1(%arg0: i32) -> (i32, i32) {
    %c0_i32 = arith.constant 0 : i32
    %c0_i32_0 = arith.constant 0 : i32
    %c0_i32_1 = arith.constant 0 : i32
    return %c0_i32, %c0_i32_0 : i32, i32
  }
  func.func @transform_2(%arg0: i32) -> (i32, i32) {
    %c0_i32 = arith.constant 0 : i32
    %c0_i32_0 = arith.constant 0 : i32
    return %arg0, %c0_i32 : i32, i32
  }
}

</mosaic_0001>

<bundles_post_ra>
// kernel: tpu_custom_call.1
= control target key start
LH: loop header
LB: loop body
LE: loop exit
PB: predicated region body
PF: predicated region fallthrough
CT: control target
= control target key end

     0   :  { %v255_v0 = vmov 0   ;;  %vm197_vm0 = vcmask 408576   ;;  %s425_s0 = inlined_call_operand.vmem [shape: f32[128,1], index: 0, kind: input, shape index: {}]   ;;  %s426_s1 = inlined_call_operand.vmem [shape: f32[2,50], index: 1, kind: input, shape index: {}]   ;;  %s427_s2 = inlined_call_operand.vmem [shape: f32[128,50], index: 2, kind: output, shape index: {}]  }
   0x1   :  { %222 = vset.pattern.permute.xlu1 %v255_v0  ;;  %221 = vset.pattern.permute.xlu0 %v255_v0  ;;  %v13_v1 = vld [vmem:[%s425_s0 + $0x10] sm:$0xff]  ;;  %v11_v2 = vld [vmem:[%s425_s0] sm:$0xff]  ;;  %v14_v3 = vld [vmem:[%s425_s0 + $0x18] sm:$0xff] }
   0x2   :  { %41 = vperm.xlu1 %222, %v13_v1   ;;  %31 = vperm.xlu0 %221, %v11_v2   ;;  %v12_v4 = vld [vmem:[%s425_s0 + $0x8] sm:$0xff]  ;;  %v15_v6 = vld [vmem:[%s425_s0 + $0x20] sm:$0xff]  ;;  %v18_v7 = vld [vmem:[%s425_s0 + $0x38] sm:$0xff] }
   0x3   :  { %v16_v5 = vld [vmem:[%s425_s0 + $0x28] sm:$0xff]  ;;  %v17_v8 = vld [vmem:[%s425_s0 + $0x30] sm:$0xff]  ;;  %v19_v10 = vld [vmem:[%s425_s0 + $0x40] sm:$0xff] }
   0x4   :  { %v20_v9 = vld [vmem:[%s425_s0 + $0x48] sm:$0xff]  ;;  %v22_v11 = vld [vmem:[%s425_s0 + $0x58] sm:$0xff]  ;;  %v21_v12 = vld [vmem:[%s425_s0 + $0x50] sm:$0xff] }
   0x5   :  { %v24_v13 = vld [vmem:[%s425_s0 + $0x68] sm:$0xff]  ;;  %v23_v14 = vld [vmem:[%s425_s0 + $0x60] sm:$0xff]  ;;  %v26_v15 = vld [vmem:[%s425_s0 + $0x78] sm:$0xff] }
   0x6   :  { %46 = vperm.xlu1 %222, %v14_v3   ;;  %36 = vperm.xlu0 %221, %v12_v4   ;;  %v25_v16 = vld [vmem:[%s425_s0 + $0x70] sm:$0xff]  ;;  %v322_v17 = vld [vmem:[%s426_s1] ss:$0 sm:$0xff]  ;;  %v329_v22 = vld [vmem:[%s426_s1 + $0x1] ss:$0 sm:$0xff] }
   0xa   :  { %56 = vperm.xlu1 %222, %v16_v5   ;;  %51 = vperm.xlu0 %221, %v15_v6  }
   0xe   :  { %66 = vperm.xlu1 %222, %v18_v7   ;;  %61 = vperm.xlu0 %221, %v17_v8  }
  0x12   :  { %76 = vperm.xlu1 %222, %v20_v9   ;;  %71 = vperm.xlu0 %221, %v19_v10  }
  0x16   :  { %86 = vperm.xlu1 %222, %v22_v11   ;;  %81 = vperm.xlu0 %221, %v21_v12  }
  0x1a   :  { %96 = vperm.xlu1 %222, %v24_v13   ;;  %91 = vperm.xlu0 %221, %v23_v14  }
  0x1e   :  { %106 = vperm.xlu1 %222, %v26_v15   ;;  %101 = vperm.xlu0 %221, %v25_v16  }
  0x7d   :  { %v42_v18 = vpop.permute.xlu1 %41  ;;  %v32_v19 = vpop.permute.xlu0 %31 }
  0x7e   :  { %v115_v20 = vsub.f32 %v42_v18, %v322_v17  ;;  %v113_v21 = vsub.f32 %v32_v19, %v322_v17 }
  0x80   :  { %v131_v23 = vmul.f32 %v115_v20, %v115_v20  ;;  %v129_v24 = vmul.f32 %v113_v21, %v113_v21 }
  0x81   :  { %v47_v25 = vpop.permute.xlu1 %46  ;;  %v37_v26 = vpop.permute.xlu0 %36 }
  0x82   :  { %v151_v27 = vmul.f32 %v329_v22, %v131_v23  ;;  %v149_v28 = vmul.f32 %v329_v22, %v129_v24  ;;  %v116_v29 = vsub.f32 %v47_v25, %v322_v17  ;;  %v114_v30 = vsub.f32 %v37_v26, %v322_v17 }
  0x84   :  { %v169_v31 = vmul.f32 1.442695, %v151_v27  ;;  %v165_v32 = vmul.f32 1.442695, %v149_v28  ;;  %v132_v33 = vmul.f32 %v116_v29, %v116_v29  ;;  %v130_v34 = vmul.f32 %v114_v30, %v114_v30 }
  0x85   :  { %v57_v35 = vpop.permute.xlu1 %56  ;;  %v52_v36 = vpop.permute.xlu0 %51 }
  0x86   :  { %223 = vpow2.f32 %v169_v31  ;;  %v152_v37 = vmul.f32 %v329_v22, %v132_v33  ;;  %v150_v38 = vmul.f32 %v329_v22, %v130_v34  ;;  %v118_v39 = vsub.f32 %v57_v35, %v322_v17 }
  0x87   :  { %225 = vpow2.f32 %v165_v32  ;;  %v117_v40 = vsub.f32 %v52_v36, %v322_v17 }
  0x88   :  { %v171_v41 = vmul.f32 1.442695, %v152_v37  ;;  %v167_v42 = vmul.f32 1.442695, %v150_v38  ;;  %v134_v43 = vmul.f32 %v118_v39, %v118_v39 }
  0x89   :  { %v133_v44 = vmul.f32 %v117_v40, %v117_v40  ;;  %v67_v45 = vpop.permute.xlu1 %66  ;;  %v62_v46 = vpop.permute.xlu0 %61 }
  0x8a   :  { %227 = vpow2.f32 %v171_v41  ;;  %v154_v47 = vmul.f32 %v329_v22, %v134_v43  ;;  %v120_v48 = vsub.f32 %v67_v45, %v322_v17  ;;  %v119_v49 = vsub.f32 %v62_v46, %v322_v17 }
  0x8b   :  { %229 = vpow2.f32 %v167_v42  ;;  %v153_v50 = vmul.f32 %v329_v22, %v133_v44 }
  0x8c   :  { %v175_v51 = vmul.f32 1.442695, %v154_v47  ;;  %v136_v52 = vmul.f32 %v120_v48, %v120_v48  ;;  %v135_v53 = vmul.f32 %v119_v49, %v119_v49 }
  0x8d   :  { %v173_v54 = vmul.f32 1.442695, %v153_v50  ;;  %v77_v55 = vpop.permute.xlu1 %76  ;;  %v72_v56 = vpop.permute.xlu0 %71 }
  0x8e   :  { %231 = vpow2.f32 %v175_v51  ;;  %v156_v57 = vmul.f32 %v329_v22, %v136_v52  ;;  %v155_v58 = vmul.f32 %v329_v22, %v135_v53  ;;  %v122_v59 = vsub.f32 %v77_v55, %v322_v17 }
  0x8f   :  { %233 = vpow2.f32 %v173_v54  ;;  %v121_v60 = vsub.f32 %v72_v56, %v322_v17 }
  0x90   :  { %v179_v61 = vmul.f32 1.442695, %v156_v57  ;;  %v177_v62 = vmul.f32 1.442695, %v155_v58  ;;  %v138_v63 = vmul.f32 %v122_v59, %v122_v59 }
  0x91   :  { %v137_v0 = vmul.f32 %v121_v60, %v121_v60  ;;  %v87_v1 = vpop.permute.xlu1 %86  ;;  %v82_v2 = vpop.permute.xlu0 %81 }
  0x92   :  { %235 = vpow2.f32 %v179_v61  ;;  %v158_v3 = vmul.f32 %v329_v22, %v138_v63  ;;  %v124_v4 = vsub.f32 %v87_v1, %v322_v17  ;;  %v123_v5 = vsub.f32 %v82_v2, %v322_v17 }
  0x93   :  { %v224_v6 = vpop.eup %223  ;;  %237 = vpow2.f32 %v177_v62  ;;  %v157_v7 = vmul.f32 %v329_v22, %v137_v0 }
  0x94   :  { %v226_v8 = vpop.eup %225  ;;  %200 = vst.msk [vmem:[%s427_s2 + $0x10] sm:$0xff] %vm197_vm0, %v224_v6  ;;  %v183_v9 = vmul.f32 1.442695, %v158_v3  ;;  %v140_v10 = vmul.f32 %v124_v4, %v124_v4  ;;  %v139_v11 = vmul.f32 %v123_v5, %v123_v5 }
  0x95   :  { %198 = vst.msk [vmem:[%s427_s2] sm:$0xff] %vm197_vm0, %v226_v8  ;;  %v181_v12 = vmul.f32 1.442695, %v157_v7  ;;  %v97_v13 = vpop.permute.xlu1 %96  ;;  %v92_v14 = vpop.permute.xlu0 %91 }
  0x96   :  { %239 = vpow2.f32 %v183_v9  ;;  %v160_v15 = vmul.f32 %v329_v22, %v140_v10  ;;  %v159_v16 = vmul.f32 %v329_v22, %v139_v11  ;;  %v126_v18 = vsub.f32 %v97_v13, %v322_v17 }
  0x97   :  { %v228_v19 = vpop.eup %227  ;;  %241 = vpow2.f32 %v181_v12  ;;  %v125_v20 = vsub.f32 %v92_v14, %v322_v17 }
  0x98   :  { %v230_v21 = vpop.eup %229  ;;  %201 = vst.msk [vmem:[%s427_s2 + $0x18] sm:$0xff] %vm197_vm0, %v228_v19  ;;  %v187_v23 = vmul.f32 1.442695, %v160_v15  ;;  %v185_v24 = vmul.f32 1.442695, %v159_v16  ;;  %v142_v25 = vmul.f32 %v126_v18, %v126_v18 }
  0x99   :  { %199 = vst.msk [vmem:[%s427_s2 + $0x8] sm:$0xff] %vm197_vm0, %v230_v21  ;;  %v141_v26 = vmul.f32 %v125_v20, %v125_v20  ;;  %v107_v27 = vpop.permute.xlu1 %106  ;;  %v102_v28 = vpop.permute.xlu0 %101 }
  0x9a   :  { %243 = vpow2.f32 %v187_v23  ;;  %v162_v29 = vmul.f32 %v329_v22, %v142_v25  ;;  %v128_v30 = vsub.f32 %v107_v27, %v322_v17  ;;  %v127_v31 = vsub.f32 %v102_v28, %v322_v17 }
  0x9b   :  { %v232_v32 = vpop.eup %231  ;;  %245 = vpow2.f32 %v185_v24  ;;  %v161_v33 = vmul.f32 %v329_v22, %v141_v26 }
  0x9c   :  { %v234_v34 = vpop.eup %233  ;;  %203 = vst.msk [vmem:[%s427_s2 + $0x28] sm:$0xff] %vm197_vm0, %v232_v32  ;;  %v191_v35 = vmul.f32 1.442695, %v162_v29  ;;  %v144_v36 = vmul.f32 %v128_v30, %v128_v30  ;;  %v143_v37 = vmul.f32 %v127_v31, %v127_v31 }
  0x9d   :  { %202 = vst.msk [vmem:[%s427_s2 + $0x20] sm:$0xff] %vm197_vm0, %v234_v34  ;;  %v189_v38 = vmul.f32 1.442695, %v161_v33 }
  0x9e   :  { %247 = vpow2.f32 %v191_v35  ;;  %v164_v17 = vmul.f32 %v329_v22, %v144_v36  ;;  %v163_v39 = vmul.f32 %v329_v22, %v143_v37 }
  0x9f   :  { %v236_v40 = vpop.eup %235  ;;  %249 = vpow2.f32 %v189_v38 }
  0xa0   :  { %v238_v41 = vpop.eup %237  ;;  %205 = vst.msk [vmem:[%s427_s2 + $0x38] sm:$0xff] %vm197_vm0, %v236_v40  ;;  %v195_v42 = vmul.f32 1.442695, %v164_v17  ;;  %v193_v43 = vmul.f32 1.442695, %v163_v39 }
  0xa1   :  { %204 = vst.msk [vmem:[%s427_s2 + $0x30] sm:$0xff] %vm197_vm0, %v238_v41 }
  0xa2   :  { %251 = vpow2.f32 %v195_v42 }
  0xa3   :  { %v240_v44 = vpop.eup %239  ;;  %253 = vpow2.f32 %v193_v43 }
  0xa4   :  { %v242_v45 = vpop.eup %241  ;;  %207 = vst.msk [vmem:[%s427_s2 + $0x48] sm:$0xff] %vm197_vm0, %v240_v44 }
  0xa5   :  { %206 = vst.msk [vmem:[%s427_s2 + $0x40] sm:$0xff] %vm197_vm0, %v242_v45 }
  0xa7   :  { %v244_v22 = vpop.eup %243 }
  0xa8   :  { %v246_v46 = vpop.eup %245  ;;  %209 = vst.msk [vmem:[%s427_s2 + $0x58] sm:$0xff] %vm197_vm0, %v244_v22 }
  0xa9   :  { %208 = vst.msk [vmem:[%s427_s2 + $0x50] sm:$0xff] %vm197_vm0, %v246_v46 }
  0xab   :  { %v248_v47 = vpop.eup %247 }
  0xac   :  { %v250_v48 = vpop.eup %249  ;;  %211 = vst.msk [vmem:[%s427_s2 + $0x68] sm:$0xff] %vm197_vm0, %v248_v47 }
  0xad   :  { %210 = vst.msk [vmem:[%s427_s2 + $0x60] sm:$0xff] %vm197_vm0, %v250_v48 }
  0xaf   :  { %v252_v49 = vpop.eup %251 }
  0xb0   :  { %v254_v50 = vpop.eup %253  ;;  %213 = vst.msk [vmem:[%s427_s2 + $0x78] sm:$0xff] %vm197_vm0, %v252_v49 }
  0xb1   :  { %212 = vst.msk [vmem:[%s427_s2 + $0x70] sm:$0xff] %vm197_vm0, %v254_v50 }

</bundles_post_ra>
